<compile_context>
chip_gen: v6e
topology: v6e:2x2x1
jax: 0.10.0
libtpu: 0.0.40
codegen_flags: <defaults>
</compile_context>

<pallas_src>
import jax
import jax.numpy as jnp
from jax.experimental import pallas as pl
from jax.experimental.pallas import tpu as pltpu

_MAX_INFLIGHT_DMAS = 4


def chomp1d(x: jnp.ndarray, chomp_size: int) -> jnp.ndarray:
    """Drop the last `chomp_size` samples along axis 1 of [M, Kpad, H]."""
    M, Kpad, H = x.shape
    K = Kpad - chomp_size
    assert 0 < K < Kpad, "chomp_size must be in (0, Kpad)"

    itemsize = jnp.dtype(x.dtype).itemsize
    L_in = Kpad * H   # flattened input row length
    L_out = K * H     # flattened kept-prefix length

    # Free metadata reshape: row-major [M, Kpad, H] -> [M, Kpad*H]; the kept
    # region is exactly the first L_out elements of each row.
    x2 = x.reshape(M, L_in)

    # Static row chunking (a few DMAs in flight to hide issue latency).
    n_chunks = min(M, _MAX_INFLIGHT_DMAS)
    base, rem = divmod(M, n_chunks)
    chunks = []
    r0 = 0
    for c in range(n_chunks):
        rows = base + (1 if c < rem else 0)
        chunks.append((r0, rows))
        r0 += rows

    def kernel(x_ref, o_ref, sem_ref):
        copies = []
        for c, (row0, rows) in enumerate(chunks):
            cp = pltpu.make_async_copy(
                x_ref.at[pl.ds(row0, rows), pl.ds(0, L_out)],  # strided prefix
                o_ref.at[pl.ds(row0, rows)],                   # dense rows
                sem_ref.at[c],
            )
            cp.start()
            copies.append(cp)
        for cp in copies:
            cp.wait()

    out2 = pl.pallas_call(
        kernel,
        out_shape=jax.ShapeDtypeStruct((M, L_out), x.dtype),
        in_specs=[pl.BlockSpec(memory_space=pl.ANY)],
        out_specs=pl.BlockSpec(memory_space=pl.ANY),
        scratch_shapes=[pltpu.SemaphoreType.DMA((n_chunks,))],
        cost_estimate=pl.CostEstimate(
            flops=0,
            transcendentals=0,
            bytes_accessed=2 * M * L_out * itemsize,  # read kept + write kept
        ),
    )(x2)

    return out2.reshape(M, K, H)


if __name__ == "__main__":
    key = jax.random.PRNGKey(0)

    # Test 1: aligned case (K*H = 256, multiple of 128).
    M, Kpad, H, chomp = 2, 24, 16, 8
    x = jax.random.normal(key, (M, Kpad, H), dtype=jnp.float32)
    y = jax.block_until_ready(chomp1d(x, chomp))
    assert y.shape == (M, Kpad - chomp, H)
    assert jnp.array_equal(y, x[:, :-chomp, :])

    # Test 2: ragged case from the module docstring shape family
    # (K*H = 500, not a multiple of 128) — exercises element-granular DMA.
    M2, Kpad2, H2, chomp2 = 3, 110, 5, 10
    x2 = jax.random.normal(jax.random.PRNGKey(0), (M2, Kpad2, H2),
                           dtype=jnp.float32)
    y2 = jax.block_until_ready(chomp1d(x2, chomp2))
    assert y2.shape == (M2, Kpad2 - chomp2, H2)
    assert jnp.array_equal(y2, x2[:, :-chomp2, :])

    print("KERNEL_OK")
</pallas_src>

<mosaic_0001>
module attributes {stable_mosaic.version = 11 : i64} {
  func.func @kernel(%arg0: memref<2x384xf32, #tpu.memory_space<any>>, %arg1: memref<2x256xf32, #tpu.memory_space<any>>, %arg2: memref<2x!tpu.dma_semaphore, #tpu.memory_space<semaphore_mem>>) attributes {dimension_semantics = [], scalar_prefetch = 0 : i64, scratch_operands = 1 : i64, tpu.core_type = #tpu.core_type<tc>} {
    %c0_i32 = arith.constant 0 : i32
    %c0_i32_0 = arith.constant 0 : i32
    %c0_i32_1 = arith.constant 0 : i32
    %0 = tpu.memref_slice %arg0[%c0_i32_0, %c0_i32_1] : memref<2x384xf32, #tpu.memory_space<any>> -> memref<1x256xf32, #tpu.memory_space<any>>
    %c0_i32_2 = arith.constant 0 : i32
    %c0_i32_3 = arith.constant 0 : i32
    %1 = tpu.memref_slice %arg1[%c0_i32_2, %c0_i32_3] : memref<2x256xf32, #tpu.memory_space<any>> -> memref<1x256xf32, #tpu.memory_space<any>>
    %2 = tpu.memref_slice %arg2[%c0_i32] : memref<2x!tpu.dma_semaphore, #tpu.memory_space<semaphore_mem>> -> memref<1x!tpu.dma_semaphore, #tpu.memory_space<semaphore_mem>>
    %3 = tpu.memref_squeeze %2 : memref<1x!tpu.dma_semaphore, #tpu.memory_space<semaphore_mem>> -> memref<!tpu.dma_semaphore, #tpu.memory_space<semaphore_mem>>
    tpu.enqueue_dma source(%0 : memref<1x256xf32, #tpu.memory_space<any>>) target(%1 : memref<1x256xf32, #tpu.memory_space<any>>) target_semaphore(%3 : memref<!tpu.dma_semaphore, #tpu.memory_space<semaphore_mem>>)
    %c1_i32 = arith.constant 1 : i32
    %c1_i32_4 = arith.constant 1 : i32
    %c0_i32_5 = arith.constant 0 : i32
    %4 = tpu.memref_slice %arg0[%c1_i32_4, %c0_i32_5] : memref<2x384xf32, #tpu.memory_space<any>> -> memref<1x256xf32, #tpu.memory_space<any>>
    %c1_i32_6 = arith.constant 1 : i32
    %c0_i32_7 = arith.constant 0 : i32
    %5 = tpu.memref_slice %arg1[%c1_i32_6, %c0_i32_7] : memref<2x256xf32, #tpu.memory_space<any>> -> memref<1x256xf32, #tpu.memory_space<any>>
    %6 = tpu.memref_slice %arg2[%c1_i32] : memref<2x!tpu.dma_semaphore, #tpu.memory_space<semaphore_mem>> -> memref<1x!tpu.dma_semaphore, #tpu.memory_space<semaphore_mem>>
    %7 = tpu.memref_squeeze %6 : memref<1x!tpu.dma_semaphore, #tpu.memory_space<semaphore_mem>> -> memref<!tpu.dma_semaphore, #tpu.memory_space<semaphore_mem>>
    tpu.enqueue_dma source(%4 : memref<1x256xf32, #tpu.memory_space<any>>) target(%5 : memref<1x256xf32, #tpu.memory_space<any>>) target_semaphore(%7 : memref<!tpu.dma_semaphore, #tpu.memory_space<semaphore_mem>>)
    %c0_i32_8 = arith.constant 0 : i32
    %c0_i32_9 = arith.constant 0 : i32
    %c0_i32_10 = arith.constant 0 : i32
    %8 = tpu.memref_slice %arg0[%c0_i32_9, %c0_i32_10] : memref<2x384xf32, #tpu.memory_space<any>> -> memref<1x256xf32, #tpu.memory_space<any>>
    %c0_i32_11 = arith.constant 0 : i32
    %c0_i32_12 = arith.constant 0 : i32
    %9 = tpu.memref_slice %arg1[%c0_i32_11, %c0_i32_12] : memref<2x256xf32, #tpu.memory_space<any>> -> memref<1x256xf32, #tpu.memory_space<any>>
    %10 = tpu.memref_slice %arg2[%c0_i32_8] : memref<2x!tpu.dma_semaphore, #tpu.memory_space<semaphore_mem>> -> memref<1x!tpu.dma_semaphore, #tpu.memory_space<semaphore_mem>>
    %11 = tpu.memref_squeeze %10 : memref<1x!tpu.dma_semaphore, #tpu.memory_space<semaphore_mem>> -> memref<!tpu.dma_semaphore, #tpu.memory_space<semaphore_mem>>
    tpu.wait_dma2 semaphore(%11 : memref<!tpu.dma_semaphore, #tpu.memory_space<semaphore_mem>>) src(%8 : memref<1x256xf32, #tpu.memory_space<any>>) dst(%9 : memref<1x256xf32, #tpu.memory_space<any>>)
    %c1_i32_13 = arith.constant 1 : i32
    %c1_i32_14 = arith.constant 1 : i32
    %c0_i32_15 = arith.constant 0 : i32
    %12 = tpu.memref_slice %arg0[%c1_i32_14, %c0_i32_15] : memref<2x384xf32, #tpu.memory_space<any>> -> memref<1x256xf32, #tpu.memory_space<any>>
    %c1_i32_16 = arith.constant 1 : i32
    %c0_i32_17 = arith.constant 0 : i32
    %13 = tpu.memref_slice %arg1[%c1_i32_16, %c0_i32_17] : memref<2x256xf32, #tpu.memory_space<any>> -> memref<1x256xf32, #tpu.memory_space<any>>
    %14 = tpu.memref_slice %arg2[%c1_i32_13] : memref<2x!tpu.dma_semaphore, #tpu.memory_space<semaphore_mem>> -> memref<1x!tpu.dma_semaphore, #tpu.memory_space<semaphore_mem>>
    %15 = tpu.memref_squeeze %14 : memref<1x!tpu.dma_semaphore, #tpu.memory_space<semaphore_mem>> -> memref<!tpu.dma_semaphore, #tpu.memory_space<semaphore_mem>>
    tpu.wait_dma2 semaphore(%15 : memref<!tpu.dma_semaphore, #tpu.memory_space<semaphore_mem>>) src(%12 : memref<1x256xf32, #tpu.memory_space<any>>) dst(%13 : memref<1x256xf32, #tpu.memory_space<any>>)
    return
  }
}

</mosaic_0001>

<bundles_post_ra>
// kernel: tpu_custom_call.1
= control target key start
LH: loop header
LB: loop body
LE: loop exit
PB: predicated region body
PF: predicated region fallthrough
CT: control target
= control target key end

     0   :  { %s65_s6 = smov 32   ;;  %s66_s7 = smov 1   ;;  %s93_s0 = inlined_call_operand.hbm [shape: f32[2,384], index: 0, kind: input, shape index: {}]   ;;  %s94_s1 = inlined_call_operand.hbm [shape: f32[2,256], index: 1, kind: output, shape index: {}]  }
   0x1   :  { %12 = sst [smem:[#allocation4]] %s65_s6  ;;  %s67_s8 = smov [#allocation2]  }
   0x2   :  { %14 = sst [smem:[#allocation4 + $0x1]] %s65_s6  ;;  %s68_s9 = smov 131072  }
   0x3   :  { %16 = sst [smem:[#allocation4 + $0x2]] %s66_s7  ;;  %s69_s10 = smov 0  }
   0x4   :  { %18 = dma.general %s93_s0, 32, %s94_s1, %s67_s8, %s68_s9, [#allocation4], %s69_s10, 0  }
   0x5   :  { %28 = sst [smem:[#allocation6]] %s65_s6  ;;  %s19_s17 = scalar_lea.hbm %s93_s0, 16 }
   0x6   :  { %30 = sst [smem:[#allocation6 + $0x1]] %s65_s6  ;;  %s20_s20 = scalar_lea.hbm %s94_s1, 16 }
   0x7   :  { %32 = sst [smem:[#allocation6 + $0x2]] %s66_s7  ;;  %s70_s21 = smov [#allocation2 + $0x1]  }
   0x8   :  { %34 = dma.general %s19_s17, 32, %s20_s20, %s70_s21, %s68_s9, [#allocation6], %s69_s10, 0  }
   0x9   :  { %61 = dma.done.wait [#allocation2], 32 }
   0xa   :  { %62 = vsyncadd [#allocation2], 4294967264 }
   0xb   :  { %63 = dma.done.wait [#allocation2 + $0x1], 32 }
   0xc   :  { %64 = vsyncadd [#allocation2 + $0x1], 4294967264 }
   0xd   :  { %40 = vsyncmov [#allocation2] }
  0x10   :  { %s41_s22 = vpop.sfrf %40 }
  0x11   :  { %p53_p0 = scmp.ne.s32.totalorder %s41_s22, 0 }
  0x13   :  { %45 = shalt.err (%p53_p0)  }
  0x14   :  { %47 = vsyncmov [#allocation2 + $0x1] }
  0x17   :  { %s48_s23 = vpop.sfrf %47 }
  0x18   :  { %p54_p1 = scmp.ne.s32.totalorder %s48_s23, 0 }
  0x1a   :  { %52 = shalt.err (%p54_p1)  }

</bundles_post_ra>
